<compile_context>
chip_gen: v7x
topology: tpu7x:2x2x1
jax: 0.10.0
libtpu: 0.0.40
codegen_flags: <defaults>
</compile_context>

<pallas_src>
import functools

import jax
import jax.numpy as jnp
from jax.experimental import pallas as pl
from jax.experimental.pallas import tpu as pltpu


# ----------------------------------------------------------------------------- utils


def _round_hidden(hidden_dim: int, multiple_of: int = 256) -> int:
    """Mirror the PyTorch module's hidden-dim rounding."""
    hidden_dim = (2 * hidden_dim) // 3
    return multiple_of * ((hidden_dim + multiple_of - 1) // multiple_of)


def _round_up(x: int, m: int) -> int:
    return (x + m - 1) // m * m


def _cdiv(a: int, b: int) -> int:
    return (a + b - 1) // b


def _pick_tile(total: int, target: int, align: int) -> int:
    """Largest multiple of `align` that divides `total` and is <= target (or total)."""
    if total <= target:
        return total
    best = align
    t = align
    while t <= target:
        if total % t == 0:
            best = t
        t += align
    return best


def _vmem_capacity_bytes() -> int:
    try:
        return int(pltpu.get_tpu_info().vmem_capacity_bytes)
    except Exception:
        return 64 * 1024 * 1024  # conservative (v7x-sized) fallback


def _choose_tiles(M, D, H, cbytes, out_bytes, tm_target, th_target, tile_budget):
    """Pick (tm, th) tiles: MXU-aligned, VMEM-budgeted, megacore-friendly."""
    # Hidden tile: divisor of H, multiple of 256 preferred (v6e/v7x 2x256 MXU);
    # fall back to 128 (v5e MXU width) for awkward H.
    th = _pick_tile(H, th_target, 256)
    if H % th != 0:
        th = _pick_tile(H, th_target, 128)

    # Row tile: multiple of 16 (bf16 sublane packing).  For small M, cap at ~M/2 so
    # the parallel row axis has >= 2 entries and both v7x TensorCores get work.
    m16 = _round_up(M, 16)
    if m16 <= tm_target:
        tm = m16 if m16 <= 16 else max(16, _round_up(_cdiv(m16, 2), 16))
    else:
        tm = _round_up(tm_target, 16)

    def resident(tm_, th_):
        # double-buffered x / out / 3 weight tiles + f32 accumulator scratch
        return D * (tm_ * (2 * cbytes + 2 * out_bytes + 4) + 6 * th_ * cbytes)

    # Shrink th first (weight arithmetic intensity depends on tm, not th), then tm.
    while resident(tm, th) > tile_budget and th > 256:
        nth = _pick_tile(H, th // 2, 256)
        if H % nth != 0:
            nth = _pick_tile(H, th // 2, 128)
        if nth >= th or H % nth != 0:
            break
        th = nth
    while resident(tm, th) > tile_budget and tm > 128:
        tm = max(128, _round_up(tm // 2, 16))

    return tm, th


# ----------------------------------------------------------------------------- kernel


def _swiglu_mlp_kernel(x_ref, w1_ref, w3_ref, w2_ref, o_ref, acc_ref):
    # x_ref : (tm, D)   token-row tile, compute dtype (bf16); resident across h
    # w1_ref: (D, tH)   W1^T tile   (natural (K, N) MXU feed, no in-kernel transpose)
    # w3_ref: (D, tH)   W3^T tile
    # w2_ref: (tH, D)   W2^T tile
    # o_ref : (tm, D)   output tile (revisited across the hidden axis)
    # acc   : (tm, D)   f32 accumulator scratch
    h = pl.program_id(1)

    @pl.when(h == 0)
    def _init():
        acc_ref[...] = jnp.zeros_like(acc_ref)

    x = x_ref[...]
    h1 = jnp.dot(x, w1_ref[...], preferred_element_type=jnp.float32)
    h3 = jnp.dot(x, w3_ref[...], preferred_element_type=jnp.float32)

    # SiLU + gating in f32 (VPU/EUP), single cast back for the down-projection MXU.
    gate = (h1 * jax.nn.sigmoid(h1) * h3).astype(w2_ref.dtype)          # (tm, tH)

    acc_ref[...] += jnp.dot(gate, w2_ref[...], preferred_element_type=jnp.float32)

    @pl.when(h == pl.num_programs(1) - 1)
    def _finalize():
        o_ref[...] = acc_ref[...].astype(o_ref.dtype)


# ----------------------------------------------------------------------------- wrapper


def prepare_weights(w1, w2, w3, compute_dtype=jnp.bfloat16):
    """One-time weight prep (do at load time, NOT per forward call):
    PyTorch nn.Linear (out, in) weights -> (K, N) kernel layouts in compute dtype.

    Returns (w1t, w3t, w2t) with shapes ((D,H), (D,H), (H,D))."""
    w1t = jnp.asarray(w1, compute_dtype).T
    w3t = jnp.asarray(w3, compute_dtype).T
    w2t = jnp.asarray(w2, compute_dtype).T
    return (w1t.block_until_ready(), w3t.block_until_ready(), w2t.block_until_ready())


@functools.partial(jax.jit, static_argnames=("tm", "th"))
def swiglu_mlp(x, w1t, w3t, w2t, *, tm=512, th=512):
    """SwiGLU MLP forward.

    x   : (..., D)
    w1t : (D, H) = W1.T,  w3t : (D, H) = W3.T,  w2t : (H, D) = W2.T
          (use prepare_weights() once; weights should already be in compute dtype)
    """
    orig_shape = x.shape
    out_dtype = x.dtype
    D = orig_shape[-1]
    H = w1t.shape[1]
    assert w1t.shape == (D, H) and w3t.shape == (D, H) and w2t.shape == (H, D)

    compute_dtype = w1t.dtype
    cbytes = jnp.dtype(compute_dtype).itemsize
    out_bytes = jnp.dtype(out_dtype).itemsize

    x2d = x.reshape(-1, D).astype(compute_dtype)
    M = x2d.shape[0]

    # Per-generation VMEM budget: ~96 MiB on 128 MiB parts (v5e/v6e), ~48 MiB on v7x.
    vmem_cap = _vmem_capacity_bytes()
    vmem_limit = min(int(vmem_cap * 0.75), vmem_cap - (8 << 20))
    tile_budget = int(vmem_limit * 0.85)     # headroom for compiler-internal scratch

    tm_eff, th_eff = _choose_tiles(M, D, H, cbytes, out_bytes, tm, th, tile_budget)
    assert H % th_eff == 0, (H, th_eff)      # guard against silent hidden-dim truncation

    m_pad = _round_up(M, tm_eff)
    if m_pad != M:
        x2d = jnp.pad(x2d, ((0, m_pad - M), (0, 0)))

    n_row_tiles = m_pad // tm_eff
    grid = (n_row_tiles, H // th_eff)

    cost = pl.CostEstimate(
        flops=6 * m_pad * D * H,                       # three (M,D)x(D,H)-sized matmuls
        transcendentals=m_pad * H,                     # sigmoid
        bytes_accessed=(m_pad * D * cbytes             # x
                        + n_row_tiles * 3 * H * D * cbytes   # weights re-streamed per row tile
                        + m_pad * D * out_bytes),      # output
    )

    out = pl.pallas_call(
        _swiglu_mlp_kernel,
        out_shape=jax.ShapeDtypeStruct((m_pad, D), out_dtype),
        grid_spec=pltpu.PrefetchScalarGridSpec(
            num_scalar_prefetch=0,
            grid=grid,
            in_specs=[
                pl.BlockSpec((tm_eff, D), lambda i, h: (i, 0)),   # x rows (resident over h)
                pl.BlockSpec((D, th_eff), lambda i, h: (0, h)),   # W1^T tile
                pl.BlockSpec((D, th_eff), lambda i, h: (0, h)),   # W3^T tile
                pl.BlockSpec((th_eff, D), lambda i, h: (h, 0)),   # W2^T tile
            ],
            out_specs=pl.BlockSpec((tm_eff, D), lambda i, h: (i, 0)),
            scratch_shapes=[pltpu.VMEM((tm_eff, D), jnp.float32)],
        ),
        compiler_params=pltpu.CompilerParams(
            dimension_semantics=("parallel", "arbitrary"),
            vmem_limit_bytes=vmem_limit,
        ),
        cost_estimate=cost,
    )(x2d, w1t, w3t, w2t)

    return out[:M].reshape(orig_shape)


# ----------------------------------------------------------------------------- reference


def _reference(x, w1, w2, w3, compute_dtype=jnp.bfloat16):
    """Precision-matched reference: bf16-rounded matmul inputs, f32 math."""
    f32 = jnp.float32
    xc = x.astype(compute_dtype).astype(f32)
    w1c = w1.astype(compute_dtype).astype(f32)
    w2c = w2.astype(compute_dtype).astype(f32)
    w3c = w3.astype(compute_dtype).astype(f32)
    h1 = xc @ w1c.T
    h3 = xc @ w3c.T
    g = (jax.nn.silu(h1) * h3).astype(compute_dtype).astype(f32)
    return (g @ w2c.T).astype(x.dtype)


if __name__ == "__main__":
    # Small shapes consistent with the module:
    #   dim=128, hidden_dim arg = 256 -> (2*256)//3 = 170 -> rounded up to 256.
    dim = 128
    hidden = _round_hidden(256, multiple_of=256)   # = 256
    batch, seq = 2, 8

    key = jax.random.PRNGKey(0)
    kx, k1, k2, k3 = jax.random.split(key, 4)

    x = jax.random.normal(kx, (batch, seq, dim), dtype=jnp.float32)
    # nn.Linear-style weights (out_features, in_features), no bias.
    w1 = jax.random.normal(k1, (hidden, dim), dtype=jnp.float32) * (1.0 / dim) ** 0.5
    w2 = jax.random.normal(k2, (dim, hidden), dtype=jnp.float32) * (1.0 / hidden) ** 0.5
    w3 = jax.random.normal(k3, (hidden, dim), dtype=jnp.float32) * (1.0 / dim) ** 0.5

    # One-time weight prep (layout + dtype), then the fused kernel.
    w1t, w3t, w2t = prepare_weights(w1, w2, w3)
    out = jax.block_until_ready(swiglu_mlp(x, w1t, w3t, w2t))

    ref = _reference(x, w1, w2, w3)
    assert out.shape == x.shape, (out.shape, x.shape)
    err = float(jnp.max(jnp.abs(out.astype(jnp.float32) - ref.astype(jnp.float32))))
    # bf16 MXU inputs -> compare against bf16-rounded reference; loose tol for acc order.
    assert err < 2e-2, err

    print("KERNEL_OK")
</pallas_src>

<mosaic_0001>
module attributes {stable_mosaic.version = 11 : i64} {
  func.func @_swiglu_mlp_kernel(%arg0: i32, %arg1: i32, %arg2: memref<16x128xbf16, #tpu.memory_space<vmem>>, %arg3: memref<128x256xbf16, #tpu.memory_space<vmem>>, %arg4: memref<128x256xbf16, #tpu.memory_space<vmem>>, %arg5: memref<256x128xbf16, #tpu.memory_space<vmem>>, %arg6: memref<16x128xf32, #tpu.memory_space<vmem>>, %arg7: memref<16x128xf32, #tpu.memory_space<vmem>>) attributes {dimension_semantics = [#tpu.dimension_semantics<parallel>, #tpu.dimension_semantics<arbitrary>], iteration_bounds = array<i64: 1, 1>, scalar_prefetch = 0 : i64, scratch_operands = 1 : i64, tpu.core_type = #tpu.core_type<tc>, window_params = [{transform_indices = @transform_0, window_bounds = array<i64: 16, 128>}, {transform_indices = @transform_1, window_bounds = array<i64: 128, 256>}, {transform_indices = @transform_2, window_bounds = array<i64: 128, 256>}, {transform_indices = @transform_3, window_bounds = array<i64: 256, 128>}, {transform_indices = @transform_4, window_bounds = array<i64: 16, 128>}]} {
    %c0_i32 = arith.constant 0 : i32
    %0 = arith.cmpi eq, %arg1, %c0_i32 : i32
    %1 = arith.extui %0 : i1 to i32
    %c0_i32_0 = arith.constant 0 : i32
    %2 = arith.cmpi ne, %1, %c0_i32_0 : i32
    scf.if %2 {
      %cst_17 = arith.constant 0.000000e+00 : f32
      %24 = vector.broadcast %cst_17 : f32 to vector<16x128xf32>
      %c0_18 = arith.constant 0 : index
      %c0_19 = arith.constant 0 : index
      %25 = vector.load %arg7[%c0_18, %c0_19] : memref<16x128xf32, #tpu.memory_space<vmem>>, vector<16x128xf32>
      tpu.vector_store %arg7[%c0_18, %c0_19], %24 {strides = array<i32>} : memref<16x128xf32, #tpu.memory_space<vmem>>, vector<16x128xf32>,
    } else {
    }
    %c0 = arith.constant 0 : index
    %c0_1 = arith.constant 0 : index
    %3 = vector.load %arg2[%c0, %c0_1] : memref<16x128xbf16, #tpu.memory_space<vmem>>, vector<16x128xbf16>
    %c0_2 = arith.constant 0 : index
    %c0_3 = arith.constant 0 : index
    %4 = vector.load %arg3[%c0_2, %c0_3] : memref<128x256xbf16, #tpu.memory_space<vmem>>, vector<128x256xbf16>
    %cst = arith.constant dense<0.000000e+00> : vector<16x256xf32>
    %5 = tpu.matmul %3, %4, %cst {dimension_numbers = #tpu.dot_dimension_numbers<[1], [0], [0], [1], [0, 0, 1, 1], [], []>} : vector<16x128xbf16>, vector<128x256xbf16>, vector<16x256xf32> -> vector<16x256xf32>
    %c0_4 = arith.constant 0 : index
    %c0_5 = arith.constant 0 : index
    %6 = vector.load %arg4[%c0_4, %c0_5] : memref<128x256xbf16, #tpu.memory_space<vmem>>, vector<128x256xbf16>
    %cst_6 = arith.constant dense<0.000000e+00> : vector<16x256xf32>
    %7 = tpu.matmul %3, %6, %cst_6 {dimension_numbers = #tpu.dot_dimension_numbers<[1], [0], [0], [1], [0, 0, 1, 1], [], []>} : vector<16x128xbf16>, vector<128x256xbf16>, vector<16x256xf32> -> vector<16x256xf32>
    %8 = arith.negf %5 : vector<16x256xf32>
    %9 = math.exp %8 : vector<16x256xf32>
    %cst_7 = arith.constant 1.000000e+00 : f32
    %10 = vector.broadcast %cst_7 : f32 to vector<16x256xf32>
    %11 = arith.addf %10, %9 : vector<16x256xf32>
    %12 = arith.divf %10, %11 : vector<16x256xf32>
    %13 = arith.mulf %5, %12 : vector<16x256xf32>
    %14 = arith.mulf %13, %7 : vector<16x256xf32>
    %15 = arith.truncf %14 : vector<16x256xf32> to vector<16x256xbf16>
    %c0_8 = arith.constant 0 : index
    %c0_9 = arith.constant 0 : index
    %16 = vector.load %arg7[%c0_8, %c0_9] : memref<16x128xf32, #tpu.memory_space<vmem>>, vector<16x128xf32>
    %c0_10 = arith.constant 0 : index
    %c0_11 = arith.constant 0 : index
    %17 = vector.load %arg5[%c0_10, %c0_11] : memref<256x128xbf16, #tpu.memory_space<vmem>>, vector<256x128xbf16>
    %cst_12 = arith.constant dense<0.000000e+00> : vector<16x128xf32>
    %18 = tpu.matmul %15, %17, %cst_12 {dimension_numbers = #tpu.dot_dimension_numbers<[1], [0], [0], [1], [0, 0, 1, 1], [], []>} : vector<16x256xbf16>, vector<256x128xbf16>, vector<16x128xf32> -> vector<16x128xf32>
    %19 = arith.addf %16, %18 : vector<16x128xf32>
    %c0_13 = arith.constant 0 : index
    %c0_14 = arith.constant 0 : index
    %20 = vector.load %arg7[%c0_13, %c0_14] : memref<16x128xf32, #tpu.memory_space<vmem>>, vector<16x128xf32>
    tpu.vector_store %arg7[%c0_13, %c0_14], %19 {strides = array<i32>} : memref<16x128xf32, #tpu.memory_space<vmem>>, vector<16x128xf32>,
    %c0_i32_15 = arith.constant 0 : i32
    %21 = arith.cmpi eq, %arg1, %c0_i32_15 : i32
    %22 = arith.extui %21 : i1 to i32
    %c0_i32_16 = arith.constant 0 : i32
    %23 = arith.cmpi ne, %22, %c0_i32_16 : i32
    scf.if %23 {
      %c0_17 = arith.constant 0 : index
      %c0_18 = arith.constant 0 : index
      %24 = vector.load %arg7[%c0_17, %c0_18] : memref<16x128xf32, #tpu.memory_space<vmem>>, vector<16x128xf32>
      %c0_19 = arith.constant 0 : index
      %c0_20 = arith.constant 0 : index
      %25 = vector.load %arg6[%c0_19, %c0_20] : memref<16x128xf32, #tpu.memory_space<vmem>>, vector<16x128xf32>
      tpu.vector_store %arg6[%c0_19, %c0_20], %24 {strides = array<i32>} : memref<16x128xf32, #tpu.memory_space<vmem>>, vector<16x128xf32>,
    } else {
    }
    return
  }
  func.func @transform_0(%arg0: i32, %arg1: i32) -> (i32, i32) {
    %c0_i32 = arith.constant 0 : i32
    %c0_i32_0 = arith.constant 0 : i32
    return %arg0, %c0_i32 : i32, i32
  }
  func.func @transform_1(%arg0: i32, %arg1: i32) -> (i32, i32) {
    %c0_i32 = arith.constant 0 : i32
    %c0_i32_0 = arith.constant 0 : i32
    return %c0_i32, %arg1 : i32, i32
  }
  func.func @transform_2(%arg0: i32, %arg1: i32) -> (i32, i32) {
    %c0_i32 = arith.constant 0 : i32
    %c0_i32_0 = arith.constant 0 : i32
    return %c0_i32, %arg1 : i32, i32
  }
  func.func @transform_3(%arg0: i32, %arg1: i32) -> (i32, i32) {
    %c0_i32 = arith.constant 0 : i32
    %c0_i32_0 = arith.constant 0 : i32
    return %arg1, %c0_i32 : i32, i32
  }
  func.func @transform_4(%arg0: i32, %arg1: i32) -> (i32, i32) {
    %c0_i32 = arith.constant 0 : i32
    %c0_i32_0 = arith.constant 0 : i32
    return %arg0, %c0_i32 : i32, i32
  }
}

</mosaic_0001>

<bundles_post_ra>
// kernel: swiglu_mlp.1
= control target key start
LH: loop header
LB: loop body
LE: loop exit
PB: predicated region body
PF: predicated region fallthrough
CT: control target
= control target key end

     0   :  { %9 = vsyncpa [#allocation4], 0  ;;  %s946_s0 = inlined_call_operand.vmem [shape: bf16[16,128], index: 0, kind: input, shape index: {}]   ;;  %s947_s1 = inlined_call_operand.hbm [shape: bf16[128,256], index: 1, kind: input, shape index: {}]   ;;  %s948_s2 = inlined_call_operand.hbm [shape: bf16[128,256], index: 2, kind: input, shape index: {}]   ;;  %s949_s3 = inlined_call_operand.hbm [shape: bf16[256,128], index: 3, kind: input, shape index: {}]   ;;  %s950_s4 = inlined_call_operand.hbm [shape: f32[16,128], index: 4, kind: output, shape index: {}]  }
   0x1   :  { %10 = vsyncpa [#allocation7], 0 }
   0x2   :  { %11 = vsyncpa [#allocation5], 0  ;;  %s845_s15 = smov [#allocation6]   ;;  %s846_s17 = smov [#allocation3]  }
   0x3   :  { %s31_s16 = sshll.u32 %s845_s15, 4  ;;  %s19_s18 = sshll.u32 %s846_s17, 4  ;;  %s32_s16 = int_to_ptr.vmem [resolvable:$true] %s31_s16  ;;  %s879_s18 = int_to_ptr.vmem [resolvable:$true] %s19_s18 }
   0x4   :  { %s751_s21 = scalar_lea.hbm %s948_s2, 2048 }
   0x5   :  { %p752_p0 = scmp.ne.s32.totalorder %s948_s2, %s751_s21  ;;  %p755_p1 = scmp.lt.u32.totalorder %s751_s21, %s948_s2 }
   0x7   :  { %p757_p2 = pnand %p755_p1, %p752_p0 }
   0x9   :  { %760 = shalt.err (!%p757_p2)
}
   0xa   :  { %s761_s26 = scalar_lea.vmem %s32_s16, 2048  ;;  %p766_p4 = scmp.lt.s32.totalorder %s32_s16, %s32_s16 }
   0xb   :  { %p762_p3 = scmp.ne.s32.totalorder %s32_s16, %s761_s26  ;;  %p767_p5 = scmp.lt.s32.totalorder %s761_s26, %s761_s26 }
   0xd   :  { %p768_p6 = por %p767_p5, %p766_p4 }
   0xf   :  { %p769_p7 = pnand %p768_p6, %p762_p3 }
  0x11   :  { %772 = shalt.err (!%p769_p7)
}
  0x12   :  { %s847_s27 = smov 128   ;;  %s848_s28 = smov 8  }
  0x13   :  { %37 = dma.hbm_to_vmem [thread:$0]  %s948_s2, 2048, %s32_s16, [#allocation7], %s847_s27, %s847_s27, %s848_s28  }
  0x14   :  { %s773_s7 = scalar_lea.hbm %s947_s1, 2048 }
  0x15   :  { %p774_p8 = scmp.ne.s32.totalorder %s947_s1, %s773_s7  ;;  %p777_p9 = scmp.lt.u32.totalorder %s773_s7, %s947_s1 }
  0x17   :  { %p779_p10 = pnand %p777_p9, %p774_p8 }
  0x19   :  { %782 = shalt.err (!%p779_p10)
}
  0x1a   :  { %s783_s12 = scalar_lea.vmem %s879_s18, 2048  ;;  %p788_p12 = scmp.lt.s32.totalorder %s879_s18, %s879_s18 }
  0x1b   :  { %p784_p11 = scmp.ne.s32.totalorder %s879_s18, %s783_s12  ;;  %p789_p13 = scmp.lt.s32.totalorder %s783_s12, %s783_s12 }
  0x1d   :  { %p790_p0 = por %p789_p13, %p788_p12 }
  0x1f   :  { %p791_p1 = pnand %p790_p0, %p784_p11 }
  0x21   :  { %794 = shalt.err (!%p791_p1)
}
  0x22   :  { %25 = dma.hbm_to_vmem [thread:$0]  %s947_s1, 2048, %s879_s18, [#allocation4], %s847_s27, %s847_s27, %s848_s28  }
  0x23   :  { %s849_s14 = smov [#allocation8]   ;;  %s795_s19 = scalar_lea.hbm %s949_s3, 2048 }
  0x24   :  { %s43_s15 = sshll.u32 %s849_s14, 4  ;;  %p796_p2 = scmp.ne.s32.totalorder %s949_s3, %s795_s19  ;;  %s44_s15 = int_to_ptr.vmem [resolvable:$true] %s43_s15 }
  0x25   :  { %p799_p3 = scmp.lt.u32.totalorder %s795_s19, %s949_s3 }
  0x27   :  { %p801_p4 = pnand %p799_p3, %p796_p2 }
  0x29   :  { %804 = shalt.err (!%p801_p4)
}
  0x2a   :  { %s805_s24 = scalar_lea.vmem %s44_s15, 2048  ;;  %p810_p6 = scmp.lt.s32.totalorder %s44_s15, %s44_s15 }
  0x2b   :  { %p806_p5 = scmp.ne.s32.totalorder %s44_s15, %s805_s24  ;;  %p811_p7 = scmp.lt.s32.totalorder %s805_s24, %s805_s24 }
  0x2d   :  { %p812_p8 = por %p811_p7, %p810_p6 }
  0x2f   :  { %p813_p9 = pnand %p812_p8, %p806_p5 }
  0x31   :  { %816 = shalt.err (!%p813_p9)
}
  0x32   :  { %s850_s1 = smov 64   ;;  %s851_s18 = smov 4  }
  0x33   :  { %49 = dma.hbm_to_vmem [thread:$0]  %s949_s3, 2048, %s44_s15, [#allocation7], %s850_s1, %s850_s1, %s851_s18  }
  0x34   :  { %839 = dma.done.wait [#allocation4], 2048  }
  0x35   :  { %840 = vsyncadd [#allocation4], 4294965248 }
  0x36   :  { %841 = dma.done.wait [#allocation7], 4096  }
  0x37   :  { %842 = vsyncadd [#allocation7], 4294963200  ;;  %v852_v0 = vmov 0   ;;  %v670_v1 = vld [vmem:[#allocation3 + $0x4] ss:$8 sps:$4 sm:$0xff]   ;;  %v700_v29 = vld [vmem:[%s946_s0] sm:$0xff]  }
  0x38   :  { %202 = vmatprep.mubr.bf16.mxu0 %v852_v0  ;;  %341 = vmatprep.mubr.bf16.mxu1 %v852_v0  ;;  %v672_v2 = vld [vmem:[#allocation3] ss:$8 sps:$4 sm:$0xff]   ;;  %v673_v3 = vld [vmem:[#allocation3 + $0x14] ss:$8 sps:$4 sm:$0xff]   ;;  %v675_v4 = vld [vmem:[#allocation3 + $0x10] ss:$8 sps:$4 sm:$0xff]  }
  0x39   :  { %170 = vmatprep.subr.bf16.mxu0 %v670_v1  ;;  %v676_v5 = vld [vmem:[#allocation3 + $0x24] ss:$8 sps:$4 sm:$0xff]   ;;  %v678_v6 = vld [vmem:[#allocation3 + $0x20] ss:$8 sps:$4 sm:$0xff]   ;;  %v679_v7 = vld [vmem:[#allocation3 + $0x34] ss:$8 sps:$4 sm:$0xff]  }
  0x3a   :  { %171 = vmatpush1.bf16.msra.mxu0 %v672_v2  ;;  %v691_v8 = vld [vmem:[#allocation6 + $0x4] ss:$8 sps:$4 sm:$0xff]   ;;  %v693_v9 = vld [vmem:[#allocation6] ss:$8 sps:$4 sm:$0xff]   ;;  %v681_v10 = vld [vmem:[#allocation3 + $0x30] ss:$8 sps:$4 sm:$0xff]  }
  0x3b   :  { %172 = vmatprep.subr.bf16.mxu0 %v673_v3  ;;  %v682_v11 = vld [vmem:[#allocation3 + $0x44] ss:$8 sps:$4 sm:$0xff]   ;;  %309 = vmatprep.subr.bf16.mxu1 %v691_v8  ;;  %v697_v12 = vld [vmem:[#allocation6 + $0x14] ss:$8 sps:$4 sm:$0xff]   ;;  %v699_v13 = vld [vmem:[#allocation6 + $0x10] ss:$8 sps:$4 sm:$0xff]  }
  0x3c   :  { %310 = vmatpush1.bf16.msra.mxu1 %v693_v9  ;;  %v684_v14 = vld [vmem:[#allocation3 + $0x40] ss:$8 sps:$4 sm:$0xff]   ;;  %v701_v15 = vld [vmem:[#allocation6 + $0x24] ss:$8 sps:$4 sm:$0xff]   ;;  %v685_v16 = vld [vmem:[#allocation3 + $0x54] ss:$8 sps:$4 sm:$0xff]  }
  0x3d   :  { %311 = vmatprep.subr.bf16.mxu1 %v697_v12  ;;  %v703_v17 = vld [vmem:[#allocation6 + $0x20] ss:$8 sps:$4 sm:$0xff]   ;;  %v704_v18 = vld [vmem:[#allocation6 + $0x34] ss:$8 sps:$4 sm:$0xff]   ;;  %v687_v19 = vld [vmem:[#allocation3 + $0x50] ss:$8 sps:$4 sm:$0xff]  }
  0x3e   :  { %173 = vmatpush1.bf16.msra.mxu0 %v675_v4  ;;  %v688_v20 = vld [vmem:[#allocation3 + $0x64] ss:$8 sps:$4 sm:$0xff]   ;;  %v690_v21 = vld [vmem:[#allocation3 + $0x60] ss:$8 sps:$4 sm:$0xff]   ;;  %v706_v22 = vld [vmem:[#allocation6 + $0x30] ss:$8 sps:$4 sm:$0xff]  }
  0x3f   :  { %174 = vmatprep.subr.bf16.mxu0 %v676_v5  ;;  %v694_v23 = vld [vmem:[#allocation3 + $0x74] ss:$8 sps:$4 sm:$0xff]   ;;  %v707_v24 = vld [vmem:[#allocation6 + $0x44] ss:$8 sps:$4 sm:$0xff]   ;;  %v709_v25 = vld [vmem:[#allocation6 + $0x40] ss:$8 sps:$4 sm:$0xff]  }
  0x40   :  { %312 = vmatpush1.bf16.msra.mxu1 %v699_v13  ;;  %v710_v26 = vld [vmem:[#allocation6 + $0x54] ss:$8 sps:$4 sm:$0xff]   ;;  %v696_v27 = vld [vmem:[#allocation3 + $0x70] ss:$8 sps:$4 sm:$0xff]   ;;  %v713_v30 = vld [vmem:[#allocation6 + $0x64] ss:$8 sps:$4 sm:$0xff]  }
  0x41   :  { %313 = vmatprep.subr.bf16.mxu1 %v701_v15  ;;  %v712_v28 = vld [vmem:[#allocation6 + $0x50] ss:$8 sps:$4 sm:$0xff]   ;;  %v715_v31 = vld [vmem:[#allocation6 + $0x60] ss:$8 sps:$4 sm:$0xff]   ;;  %v716_v32 = vld [vmem:[#allocation6 + $0x74] ss:$8 sps:$4 sm:$0xff]  }
  0x42   :  { %175 = vmatpush1.bf16.msra.mxu0 %v678_v6  ;;  %v718_v33 = vld [vmem:[#allocation6 + $0x70] ss:$8 sps:$4 sm:$0xff]   ;;  %v719_v34 = vld [vmem:[#allocation8 + $0x40] sm:$0xff]   ;;  %v721_v36 = vld [vmem:[#allocation8 + $0x48] sm:$0xff]   ;;  %s853_s0 = smov [#allocation9]  }
  0x43   :  { %176 = vmatprep.subr.bf16.mxu0 %v679_v7  ;;  %v720_v35 = vld [vmem:[#allocation8] sm:$0xff]   ;;  %v722_v37 = vld [vmem:[#allocation8 + $0x8] sm:$0xff]   ;;  %v723_v38 = vld [vmem:[#allocation8 + $0x50] sm:$0xff]   ;;  %s573_s30 = sshll.u32 %s853_s0, 4  ;;  %s574_s30 = int_to_ptr.vmem [resolvable:$true] %s573_s30 }
  0x44   :  { %314 = vmatpush1.bf16.msra.mxu1 %v703_v17  ;;  %v724_v39 = vld [vmem:[#allocation8 + $0x10] sm:$0xff]   ;;  %v725_v40 = vld [vmem:[#allocation8 + $0x58] sm:$0xff]   ;;  %v727_v42 = vld [vmem:[#allocation8 + $0x60] sm:$0xff]   ;;  %s817_s5 = scalar_lea.vmem %s574_s30, 256  ;;  %p822_p11 = scmp.lt.s32.totalorder %s574_s30, %s574_s30 }
  0x45   :  { %315 = vmatprep.subr.bf16.mxu1 %v704_v18  ;;  %v726_v41 = vld [vmem:[#allocation8 + $0x18] sm:$0xff]   ;;  %v728_v43 = vld [vmem:[#allocation8 + $0x20] sm:$0xff]   ;;  %v729_v44 = vld [vmem:[#allocation8 + $0x68] sm:$0xff]   ;;  %p818_p10 = scmp.ne.s32.totalorder %s574_s30, %s817_s5  ;;  %p823_p12 = scmp.lt.s32.totalorder %s817_s5, %s817_s5 }
  0x46   :  { %177 = vmatpush1.bf16.msra.mxu0 %v681_v10  ;;  %v730_v45 = vld [vmem:[#allocation8 + $0x28] sm:$0xff]   ;;  %v731_v46 = vld [vmem:[#allocation8 + $0x70] sm:$0xff]   ;;  %v733_v48 = vld [vmem:[#allocation8 + $0x78] sm:$0xff]  }
  0x47   :  { %178 = vmatprep.subr.bf16.mxu0 %v682_v11  ;;  %v732_v47 = vld [vmem:[#allocation8 + $0x30] sm:$0xff]   ;;  %v734_v49 = vld [vmem:[#allocation8 + $0x38] sm:$0xff]   ;;  %p824_p13 = por %p823_p12, %p822_p11 }
  0x48   :  { %316 = vmatpush1.bf16.msra.mxu1 %v706_v22 }
  0x49   :  { %317 = vmatprep.subr.bf16.mxu1 %v707_v24  ;;  %p825_p0 = pnand %p824_p13, %p818_p10 }
  0x4a   :  { %179 = vmatpush1.bf16.msra.mxu0 %v684_v14 }
  0x4b   :  { %180 = vmatprep.subr.bf16.mxu0 %v685_v16 }
  0x4c   :  { %318 = vmatpush1.bf16.msra.mxu1 %v709_v25 }
  0x4d   :  { %319 = vmatprep.subr.bf16.mxu1 %v710_v26 }
  0x4e   :  { %181 = vmatpush1.bf16.msra.mxu0 %v687_v19 }
  0x4f   :  { %182 = vmatprep.subr.bf16.mxu0 %v688_v20 }
  0x50   :  { %320 = vmatpush1.bf16.msra.mxu1 %v712_v28 }
  0x51   :  { %321 = vmatprep.subr.bf16.mxu1 %v713_v30 }
  0x52   :  { %183 = vmatpush1.bf16.msra.mxu0 %v690_v21 }
  0x53   :  { %184 = vmatprep.subr.bf16.mxu0 %v694_v23 }
  0x54   :  { %322 = vmatpush1.bf16.msra.mxu1 %v715_v31 }
  0x55   :  { %323 = vmatprep.subr.bf16.mxu1 %v716_v32 }
  0x56   :  { %185 = vmatpush1.bf16.msra.mxu0 %v696_v27 }
  0x57   :  { %639 = vmatprep.subr.bf16.mxu0 %v719_v34 }
  0x58   :  { %324 = vmatpush1.bf16.msra.mxu1 %v718_v33 }
  0x59   :  { %203 = vmatmul.mubr.bf16.vlgmr.msra.gmra.mrb[0].mxu0 %v700_v29 }
  0x5a   :  { %640 = vmatpush3.bf16.msra.mxu0 %v720_v35 }
  0x5b   :  { %342 = vmatmul.mubr.bf16.vlgmr.msra.gmra.mrb[0].mxu1 %v700_v29  ;;  %641 = vmatprep.subr.bf16.mxu0 %v721_v36 }
  0x5e   :  { %642 = vmatpush3.bf16.msra.mxu0 %v722_v37 }
  0x5f   :  { %643 = vmatprep.subr.bf16.mxu0 %v723_v38 }
  0x62   :  { %644 = vmatpush3.bf16.msra.mxu0 %v724_v39 }
  0x63   :  { %645 = vmatprep.subr.bf16.mxu0 %v725_v40 }
  0x66   :  { %646 = vmatpush3.bf16.msra.mxu0 %v726_v41 }
  0x67   :  { %647 = vmatprep.subr.bf16.mxu0 %v727_v42 }
  0x6a   :  { %648 = vmatpush3.bf16.msra.mxu0 %v728_v43 }
  0x6b   :  { %649 = vmatprep.subr.bf16.mxu0 %v729_v44 }
  0x6e   :  { %650 = vmatpush3.bf16.msra.mxu0 %v730_v45 }
  0x6f   :  { %651 = vmatprep.subr.bf16.mxu0 %v731_v46 }
  0x72   :  { %652 = vmatpush3.bf16.msra.mxu0 %v732_v47 }
  0x73   :  { %653 = vmatprep.subr.bf16.mxu0 %v733_v48 }
  0x76   :  { %654 = vmatpush3.bf16.msra.mxu0 %v734_v49 }
 0x12c   :  { %v204_v50 = vpop.f32.mrb[0].mxu0 }
 0x12d   :  { %v619_v51 = vmul.f32 -1.442695, %v204_v50  ;;  %v206_v52 = vpop.f32.mrb[1].mxu0 }
 0x12e   :  { %v620_v53 = vmul.f32 -1.442695, %v206_v52  ;;  %v208_v54 = vpop.f32.mrb[2].mxu0  ;;  %v343_v58 = vpop.f32.mrb[0].mxu1 }
 0x12f   :  { %735 = vpow2.f32 %v619_v51  ;;  %v621_v55 = vmul.f32 -1.442695, %v208_v54  ;;  %v210_v56 = vpop.f32.mrb[3].mxu0  ;;  %v345_v59 = vpop.f32.mrb[1].mxu1 }
 0x130   :  { %737 = vpow2.f32 %v620_v53  ;;  %v622_v57 = vmul.f32 -1.442695, %v210_v56  ;;  %v347_v60 = vpop.f32.mrb[2].mxu1 }
 0x131   :  { %739 = vpow2.f32 %v621_v55  ;;  %v349_v62 = vpop.f32.mrb[3].mxu1 }
 0x132   :  { %741 = vpow2.f32 %v622_v57 }
 0x139   :  { %v736_v61 = vpop.eup %735 }
 0x13a   :  { %v738_v63 = vpop.eup %737  ;;  %v364_v0 = vadd.f32 1.0, %v736_v61 }
 0x13b   :  { %v740_v1 = vpop.eup %739  ;;  %v365_v2 = vadd.f32 1.0, %v738_v63 }
 0x13c   :  { %v742_v3 = vpop.eup %741  ;;  %743 = vrcp.f32 %v364_v0  ;;  %v366_v4 = vadd.f32 1.0, %v740_v1 }
 0x13d   :  { %745 = vrcp.f32 %v365_v2  ;;  %v367_v5 = vadd.f32 1.0, %v742_v3 }
 0x13e   :  { %747 = vrcp.f32 %v366_v4 }
 0x13f   :  { %749 = vrcp.f32 %v367_v5 }
 0x146   :  { %v744_v6 = vpop.eup %743 }
 0x147   :  { %v746_v7 = vpop.eup %745  ;;  %v376_v8 = vmul.f32 %v744_v6, %v204_v50 }
 0x148   :  { %v748_v9 = vpop.eup %747  ;;  %v377_v10 = vmul.f32 %v746_v7, %v206_v52 }
 0x149   :  { %v750_v11 = vpop.eup %749  ;;  %v378_v12 = vmul.f32 %v748_v9, %v208_v54  ;;  %v380_v13 = vmul.f32 %v376_v8, %v343_v58 }
 0x14a   :  { %v379_v14 = vmul.f32 %v750_v11, %v210_v56  ;;  %v381_v15 = vmul.f32 %v377_v10, %v345_v59 }
 0x14b   :  { %v382_v16 = vmul.f32 %v378_v12, %v347_v60 }
 0x14c   :  { %v383_v17 = vmul.f32 %v379_v14, %v349_v62 }
 0x14d   :  { %v384_v18 = vpack.c.bf16 %v382_v16, %v380_v13 }
 0x14e   :  { %v385_v19 = vpack.c.bf16 %v383_v17, %v381_v15 }
 0x150   :  { %548 = vmatprep.mubr.bf16.mxu0 %v385_v19 }
 0x151   :  { %549 = vmatmul.mubr.bf16.vlgmr.msra.gmra.mrb[4].mxu0 %v384_v18 }
 0x224   :  { %v655_v20 = vpop.f32.mrb[4].mxu0 }
 0x225   :  { %v656_v21 = vpop.f32.mrb[5].mxu0 }
 0x226   :  { %v657_v22 = vadd.f32 %v656_v21, %v655_v20  ;;  %v658_v23 = vpop.f32.mrb[6].mxu0 }
 0x227   :  { %v659_v24 = vpop.f32.mrb[7].mxu0 }
 0x228   :  { %566 = vst [vmem:[#allocation9] sm:$0xff] %v657_v22  ;;  %v660_v25 = vadd.f32 %v659_v24, %v658_v23 }
 0x22a   :  { %567 = vst [vmem:[#allocation9 + $0x8] sm:$0xff] %v660_v25 }
 0x22b   :  { %828 = shalt.err (!%p825_p0)
}
 0x22c   :  { %s829_s8 = scalar_lea.hbm %s950_s4, 256 }
 0x22d   :  { %p830_p1 = scmp.ne.s32.totalorder %s950_s4, %s829_s8  ;;  %p833_p2 = scmp.lt.u32.totalorder %s829_s8, %s950_s4 }
 0x22f   :  { %p835_p3 = pnand %p833_p2, %p830_p1 }
 0x231   :  { %838 = shalt.err (!%p835_p3)
}
 0x232   :  { %579 = dma.vmem_to_hbm [thread:$0]  %s574_s30, 256, %s950_s4, [#allocation5], %s847_s27, %s847_s27, %s848_s28  }
 0x233   :  { %843 = dma.done.wait [#allocation5], 256  }
 0x234   :  { %844 = vsyncadd [#allocation5], 4294967040 }
 0x235   :  { %583 = vsyncpa [#allocation4], 1 }
 0x236   :  { %584 = vsyncpa [#allocation7], 1 }
 0x237   :  { %585 = vsyncpa [#allocation5], 1 }

</bundles_post_ra>
